<compile_context>
chip_gen: v7x
topology: tpu7x:2x2x1
jax: 0.10.0
libtpu: 0.0.40
codegen_flags: <defaults>
</compile_context>

<pallas_src>
import functools

import jax
import jax.numpy as jnp
from jax.experimental import pallas as pl
from jax.experimental.pallas import tpu as pltpu


def _layernorm_kernel(x_ref, g_ref, b_ref, o_ref, *, eps, n_feat):
    x = x_ref[...].astype(jnp.float32)                        # (row_tile, F)
    mean = jnp.sum(x, axis=-1, keepdims=True) * (1.0 / n_feat)
    diff = x - mean
    # unbiased variance (ddof=1), matching torch.Tensor.std()
    var = jnp.sum(diff * diff, axis=-1, keepdims=True) * (1.0 / (n_feat - 1))
    std = jnp.sqrt(var)
    # Narrow (row_tile, 1) reciprocal + broadcast multiply instead of a
    # (row_tile, F) vector divide; exact (approx=False) so the result matches
    # the plain-JAX reference to tight tolerance.
    inv = pl.reciprocal(std + eps, approx=False)
    gamma = g_ref[...].astype(jnp.float32)                     # (1, F)
    beta = b_ref[...].astype(jnp.float32)                      # (1, F)
    o_ref[...] = (gamma * (diff * inv) + beta).astype(o_ref.dtype)


def _round_up(x, m):
    return (x + m - 1) // m * m


def _choose_row_tile(rows, features, itemsize):
    """Largest row tile whose pipelined VMEM footprint is safe on every current
    TPU generation (v5e/v6e: 128 MiB physical VMEM, v7x: only 64 MiB)."""
    # Sublane packing: 8 rows per vreg-tile for 4-byte dtypes, 16 for bf16,
    # 32 for int8/fp8 -- keep the block row count aligned to it.
    row_align = max(8, 32 // max(1, itemsize))
    # Per-row VMEM estimate: x + out DMA tiles (each double-buffered) plus
    # ~3 f32-sized compiler temporaries for the reduction chain.
    bytes_per_row = features * (4 * itemsize + 12)
    tile_budget = 32 * 1024 * 1024                 # stays under the 48 MiB limit below
    max_rows = max(row_align, tile_budget // max(1, bytes_per_row))
    row_tile = min(1024, max_rows, _round_up(rows, row_align))
    return max(row_align, (row_tile // row_align) * row_align)


def layer_norm(x, gamma, beta, eps=1e-6, row_tile=None):
    """x: (..., features); gamma/beta: (features,)."""
    orig_shape = x.shape
    features = orig_shape[-1]
    rows = 1
    for d in orig_shape[:-1]:
        rows *= d
    x2 = x.reshape(rows, features)
    g2 = gamma.reshape(1, features)
    b2 = beta.reshape(1, features)

    if row_tile is None:
        row_tile = _choose_row_tile(rows, features, jnp.dtype(x.dtype).itemsize)

    # Pad rows so any input shape works with the performance-optimal tile.
    # Padded rows compute harmlessly (eps keeps them finite) and are sliced off.
    rows_padded = _round_up(rows, row_tile)
    if rows_padded != rows:
        x2 = jnp.pad(x2, ((0, rows_padded - rows), (0, 0)))

    kernel = functools.partial(_layernorm_kernel, eps=eps, n_feat=features)
    out = pl.pallas_call(
        kernel,
        out_shape=jax.ShapeDtypeStruct((rows_padded, features), x.dtype),
        grid_spec=pltpu.PrefetchScalarGridSpec(
            num_scalar_prefetch=0,
            grid=(rows_padded // row_tile,),
            in_specs=[
                pl.BlockSpec((row_tile, features), lambda i: (i, 0)),
                pl.BlockSpec((1, features), lambda i: (0, 0)),   # gamma: constant block
                pl.BlockSpec((1, features), lambda i: (0, 0)),   # beta:  constant block
            ],
            out_specs=pl.BlockSpec((row_tile, features), lambda i: (i, 0)),
        ),
        compiler_params=pltpu.CompilerParams(
            dimension_semantics=("parallel",),
            # Raise the scoped-VMEM limit (default 16 MiB on v5e / 32 MiB on
            # v6e & v7x) so the large row tiles fit; 48 MiB still leaves
            # headroom under v7x's 64 MiB physical VMEM.
            vmem_limit_bytes=48 * 1024 * 1024,
        ),
    )(x2, g2, b2)

    if rows_padded != rows:
        out = out[:rows]
    return out.reshape(orig_shape)


if __name__ == "__main__":
    key = jax.random.PRNGKey(0)
    batch, seq, hidden = 2, 8, 32
    x = jax.random.normal(key, (batch, seq, hidden), dtype=jnp.float32)

    # Deterministic parameter init, matching nn.Parameter(torch.ones/zeros(features))
    gamma = jnp.ones((hidden,), dtype=jnp.float32)
    beta = jnp.zeros((hidden,), dtype=jnp.float32)
    eps = 1e-6

    y = layer_norm(x, gamma, beta, eps=eps)
    y = jax.block_until_ready(y)

    # Reference check (plain JAX, same math as the PyTorch forward: ddof=1, eps on std)
    mean = jnp.mean(x, axis=-1, keepdims=True)
    std = jnp.sqrt(jnp.sum((x - mean) ** 2, axis=-1, keepdims=True) / (hidden - 1))
    ref = gamma * ((x - mean) / (std + eps)) + beta
    assert jnp.allclose(y, ref, atol=1e-5, rtol=1e-5), "mismatch vs reference"

    print("KERNEL_OK")
</pallas_src>

<mosaic_0001>
module attributes {stable_mosaic.version = 11 : i64} {
  func.func @_layernorm_kernel(%arg0: i32, %arg1: memref<16x32xf32, #tpu.memory_space<vmem>>, %arg2: memref<1x32xf32, #tpu.memory_space<vmem>>, %arg3: memref<1x32xf32, #tpu.memory_space<vmem>>, %arg4: memref<16x32xf32, #tpu.memory_space<vmem>>) attributes {dimension_semantics = [#tpu.dimension_semantics<parallel>], iteration_bounds = array<i64: 1>, scalar_prefetch = 0 : i64, scratch_operands = 0 : i64, tpu.core_type = #tpu.core_type<tc>, window_params = [{transform_indices = @transform_0, window_bounds = array<i64: 16, 32>}, {pipeline_mode = #tpu.pipeline_mode<synchronous>, transform_indices = @transform_1, window_bounds = array<i64: 1, 32>}, {pipeline_mode = #tpu.pipeline_mode<synchronous>, transform_indices = @transform_2, window_bounds = array<i64: 1, 32>}, {transform_indices = @transform_3, window_bounds = array<i64: 16, 32>}]} {
    %c0 = arith.constant 0 : index
    %c0_0 = arith.constant 0 : index
    %0 = vector.load %arg1[%c0, %c0_0] : memref<16x32xf32, #tpu.memory_space<vmem>>, vector<16x32xf32>
    %cst = arith.constant dense<0.000000e+00> : vector<16xf32>
    %1 = vector.multi_reduction <add>, %0, %cst [1] : vector<16x32xf32> to vector<16xf32>
    %2 = vector.shape_cast %1 : vector<16xf32> to vector<16x1xf32>
    %cst_1 = arith.constant 3.125000e-02 : f32
    %3 = vector.broadcast %cst_1 : f32 to vector<16x1xf32>
    %4 = arith.mulf %2, %3 : vector<16x1xf32>
    %5 = vector.broadcast %4 : vector<16x1xf32> to vector<16x32xf32>
    %6 = arith.subf %0, %5 : vector<16x32xf32>
    %7 = arith.mulf %6, %6 : vector<16x32xf32>
    %cst_2 = arith.constant dense<0.000000e+00> : vector<16xf32>
    %8 = vector.multi_reduction <add>, %7, %cst_2 [1] : vector<16x32xf32> to vector<16xf32>
    %9 = vector.shape_cast %8 : vector<16xf32> to vector<16x1xf32>
    %cst_3 = arith.constant 0.0322580636 : f32
    %10 = vector.broadcast %cst_3 : f32 to vector<16x1xf32>
    %11 = arith.mulf %9, %10 : vector<16x1xf32>
    %12 = math.sqrt %11 : vector<16x1xf32>
    %cst_4 = arith.constant 9.99999997E-7 : f32
    %13 = vector.broadcast %cst_4 : f32 to vector<16x1xf32>
    %14 = arith.addf %12, %13 : vector<16x1xf32>
    %15 = tpu.reciprocal %14 : vector<16x1xf32> -> vector<16x1xf32>
    %c0_5 = arith.constant 0 : index
    %c0_6 = arith.constant 0 : index
    %16 = vector.load %arg2[%c0_5, %c0_6] : memref<1x32xf32, #tpu.memory_space<vmem>>, vector<1x32xf32>
    %c0_7 = arith.constant 0 : index
    %c0_8 = arith.constant 0 : index
    %17 = vector.load %arg3[%c0_7, %c0_8] : memref<1x32xf32, #tpu.memory_space<vmem>>, vector<1x32xf32>
    %18 = vector.broadcast %15 : vector<16x1xf32> to vector<16x32xf32>
    %19 = arith.mulf %6, %18 : vector<16x32xf32>
    %20 = vector.broadcast %16 : vector<1x32xf32> to vector<16x32xf32>
    %21 = arith.mulf %20, %19 : vector<16x32xf32>
    %22 = vector.broadcast %17 : vector<1x32xf32> to vector<16x32xf32>
    %23 = arith.addf %21, %22 : vector<16x32xf32>
    %c0_9 = arith.constant 0 : index
    %c0_10 = arith.constant 0 : index
    %24 = vector.load %arg4[%c0_9, %c0_10] : memref<16x32xf32, #tpu.memory_space<vmem>>, vector<16x32xf32>
    tpu.vector_store %arg4[%c0_9, %c0_10], %23 {strides = array<i32>} : memref<16x32xf32, #tpu.memory_space<vmem>>, vector<16x32xf32>,
    return
  }
  func.func @transform_0(%arg0: i32) -> (i32, i32) {
    %c0_i32 = arith.constant 0 : i32
    %c0_i32_0 = arith.constant 0 : i32
    return %arg0, %c0_i32 : i32, i32
  }
  func.func @transform_1(%arg0: i32) -> (i32, i32) {
    %c0_i32 = arith.constant 0 : i32
    %c0_i32_0 = arith.constant 0 : i32
    %c0_i32_1 = arith.constant 0 : i32
    return %c0_i32, %c0_i32_0 : i32, i32
  }
  func.func @transform_2(%arg0: i32) -> (i32, i32) {
    %c0_i32 = arith.constant 0 : i32
    %c0_i32_0 = arith.constant 0 : i32
    %c0_i32_1 = arith.constant 0 : i32
    return %c0_i32, %c0_i32_0 : i32, i32
  }
  func.func @transform_3(%arg0: i32) -> (i32, i32) {
    %c0_i32 = arith.constant 0 : i32
    %c0_i32_0 = arith.constant 0 : i32
    return %arg0, %c0_i32 : i32, i32
  }
}

</mosaic_0001>

<bundles_post_ra>
// kernel: tpu_custom_call.1
= control target key start
LH: loop header
LB: loop body
LE: loop exit
PB: predicated region body
PF: predicated region fallthrough
CT: control target
= control target key end

     0   :  { %8 = vsyncpa [#allocation3], 0  ;;  %s237_s0 = inlined_call_operand.hbm [shape: f32[16,32], index: 0, kind: input, shape index: {}]   ;;  %s238_s1 = inlined_call_operand.vmem [shape: f32[1,32], index: 1, kind: input, shape index: {}]   ;;  %s239_s2 = inlined_call_operand.vmem [shape: f32[1,32], index: 2, kind: input, shape index: {}]   ;;  %s240_s3 = inlined_call_operand.hbm [shape: f32[16,32], index: 3, kind: output, shape index: {}]  }
   0x1   :  { %9 = vsyncpa [#allocation4], 0  ;;  %s171_s12 = smov [#allocation2]   ;;  %s123_s16 = scalar_lea.hbm %s237_s0, 256 }
   0x2   :  { %s15_s13 = sshll.u32 %s171_s12, 4  ;;  %p124_p0 = scmp.ne.s32.totalorder %s237_s0, %s123_s16  ;;  %s16_s13 = int_to_ptr.vmem [resolvable:$true] %s15_s13 }
   0x3   :  { %p127_p1 = scmp.lt.u32.totalorder %s123_s16, %s237_s0 }
   0x5   :  { %p129_p2 = pnand %p127_p1, %p124_p0 }
   0x7   :  { %132 = shalt.err (!%p129_p2)
}
   0x8   :  { %s133_s21 = scalar_lea.vmem %s16_s13, 256  ;;  %p138_p4 = scmp.lt.s32.totalorder %s16_s13, %s16_s13 }
   0x9   :  { %p134_p3 = scmp.ne.s32.totalorder %s16_s13, %s133_s21  ;;  %p139_p5 = scmp.lt.s32.totalorder %s133_s21, %s133_s21 }
   0xb   :  { %p140_p6 = por %p139_p5, %p138_p4 }
   0xd   :  { %p141_p7 = pnand %p140_p6, %p134_p3 }
   0xf   :  { %144 = shalt.err (!%p141_p7)
}
  0x10   :  { %s172_s22 = smov 128   ;;  %s173_s23 = smov 8  }
  0x11   :  { %21 = dma.hbm_to_vmem [thread:$0]  %s237_s0, 256, %s16_s13, [#allocation3], %s172_s22, %s172_s22, %s173_s23  }
  0x12   :  { %167 = dma.done.wait [#allocation3], 256  }
  0x13   :  { %168 = vsyncadd [#allocation3], 4294967040  ;;  %vm31_vm0 = vcmask 261120   ;;  %v29_v0 = vld [vmem:[#allocation2] sm:$0xff]  ;;  %v30_v1 = vld [vmem:[#allocation2 + $0x8] sm:$0xff]  ;;  %s174_s29 = smov [#allocation5]  }
  0x14   :  { %v32_v2 = vsel %vm31_vm0, %v29_v0, 0.0  ;;  %v35_v3 = vsel %vm31_vm0, %v30_v1, 0.0  ;;  %v109_v31 = vld [vmem:[%s238_s1] ss:$0 sm:$0xff]  ;;  %s97_s30 = sshll.u32 %s174_s29, 4  ;;  %s98_s30 = int_to_ptr.vmem [resolvable:$true] %s97_s30 }
  0x15   :  { %33 = vadd.xlane.f32.xlu0 %v32_v2  ;;  %v110_v33 = vld [vmem:[%s239_s2] ss:$0 sm:$0xff]  ;;  %s145_s4 = scalar_lea.vmem %s98_s30, 256  ;;  %p150_p9 = scmp.lt.s32.totalorder %s98_s30, %s98_s30 }
  0x16   :  { %p146_p8 = scmp.ne.s32.totalorder %s98_s30, %s145_s4  ;;  %p151_p10 = scmp.lt.s32.totalorder %s145_s4, %s145_s4 }
  0x18   :  { %p152_p11 = por %p151_p10, %p150_p9 }
  0x19   :  { %36 = vadd.xlane.f32.xlu0 %v35_v3 }
  0x1a   :  { %p153_p12 = pnand %p152_p11, %p146_p8 }
  0xa2   :  { %v34_v4 = vpop.xlane.xlu0 %33 }
  0xa3   :  { %v38_v5 = vmul.f32 0.03125, %v34_v4 }
  0xa5   :  { %v40_v6 = vsub.f32 %v29_v0, %v38_v5 }
  0xa6   :  { %v37_v7 = vpop.xlane.xlu0 %36 }
  0xa7   :  { %v39_v8 = vmul.f32 0.03125, %v37_v7  ;;  %v42_v9 = vmul.f32 %v40_v6, %v40_v6 }
  0xa9   :  { %v41_v10 = vsub.f32 %v30_v1, %v39_v8  ;;  %v44_v11 = vsel %vm31_vm0, %v42_v9, 0.0 }
  0xaa   :  { %45 = vadd.xlane.f32.xlu1 %v44_v11 }
  0xab   :  { %v43_v12 = vmul.f32 %v41_v10, %v41_v10 }
  0xad   :  { %v47_v13 = vsel %vm31_vm0, %v43_v12, 0.0 }
  0xae   :  { %48 = vadd.xlane.f32.xlu1 %v47_v13 }
 0x137   :  { %v46_v14 = vpop.xlane.xlu1 %45 }
 0x138   :  { %v50_v15 = vmul.f32 0.032258064, %v46_v14 }
 0x13a   :  { %115 = vrsqrt.f32 %v50_v15  ;;  %vm54_vm1 = vcmp.eq.f32.partialorder %v50_v15, inf  ;;  %v57_v20 = vand.u32 2147483648, %v50_v15  ;;  %vm56_vm2 = vcmp.eq.f32.partialorder %v50_v15, 0.0 }
 0x13b   :  { %v49_v16 = vpop.xlane.xlu1 %48 }
 0x13c   :  { %v51_v17 = vmul.f32 0.032258064, %v49_v16 }
 0x13e   :  { %117 = vrsqrt.f32 %v51_v17  ;;  %vm61_vm3 = vcmp.eq.f32.partialorder %v51_v17, inf  ;;  %v64_v26 = vand.u32 2147483648, %v51_v17  ;;  %vm63_vm4 = vcmp.eq.f32.partialorder %v51_v17, 0.0 }
 0x144   :  { %v116_v18 = vpop.eup %115 }
 0x145   :  { %v53_v19 = vmul.f32 %v116_v18, %v50_v15 }
 0x147   :  { %v55_v21 = vsel %vm54_vm1, %v50_v15, %v53_v19 }
 0x148   :  { %v118_v22 = vpop.eup %117  ;;  %v58_v23 = vsel %vm56_vm2, %v57_v20, %v55_v21 }
 0x149   :  { %v66_v24 = vadd.f32 1e-06, %v58_v23  ;;  %v60_v25 = vmul.f32 %v118_v22, %v51_v17 }
 0x14b   :  { %119 = vrcp.f32 %v66_v24  ;;  %v62_v27 = vsel %vm61_vm3, %v51_v17, %v60_v25 }
 0x14c   :  { %v65_v28 = vsel %vm63_vm4, %v64_v26, %v62_v27 }
 0x14d   :  { %v67_v29 = vadd.f32 1e-06, %v65_v28 }
 0x14f   :  { %121 = vrcp.f32 %v67_v29 }
 0x155   :  { %v120_v30 = vpop.eup %119 }
 0x156   :  { %v72_v32 = vmul.f32 %v120_v30, %v40_v6 }
 0x158   :  { %v80_v34 = vmul.f32 %v109_v31, %v72_v32 }
 0x159   :  { %v122_v35 = vpop.eup %121 }
 0x15a   :  { %v73_v36 = vmul.f32 %v122_v35, %v41_v10  ;;  %v88_v37 = vadd.f32 %v110_v33, %v80_v34 }
 0x15c   :  { %v81_v38 = vmul.f32 %v109_v31, %v73_v36  ;;  %90 = vst.msk [vmem:[#allocation5] sm:$0xff] %vm31_vm0, %v88_v37 }
 0x15e   :  { %v89_v39 = vadd.f32 %v110_v33, %v81_v38 }
 0x160   :  { %91 = vst.msk [vmem:[#allocation5 + $0x8] sm:$0xff] %vm31_vm0, %v89_v39 }
 0x161   :  { %156 = shalt.err (!%p153_p12)
}
 0x162   :  { %s157_s5 = scalar_lea.hbm %s240_s3, 256 }
 0x163   :  { %p158_p13 = scmp.ne.s32.totalorder %s240_s3, %s157_s5  ;;  %p161_p0 = scmp.lt.u32.totalorder %s157_s5, %s240_s3 }
 0x165   :  { %p163_p1 = pnand %p161_p0, %p158_p13 }
 0x167   :  { %166 = shalt.err (!%p163_p1)
}
 0x168   :  { %103 = dma.vmem_to_hbm [thread:$0]  %s98_s30, 256, %s240_s3, [#allocation4], %s172_s22, %s172_s22, %s173_s23  }
 0x169   :  { %169 = dma.done.wait [#allocation4], 256  }
 0x16a   :  { %170 = vsyncadd [#allocation4], 4294967040 }
 0x16b   :  { %107 = vsyncpa [#allocation3], 1 }
 0x16c   :  { %108 = vsyncpa [#allocation4], 1 }

</bundles_post_ra>
